<compile_context>
chip_gen: v7x
topology: tpu7x:2x2x1
jax: 0.10.0
libtpu: 0.0.40
codegen_flags: <defaults>
</compile_context>

<pallas_src>
import functools

import jax
import jax.numpy as jnp
from jax.experimental import pallas as pl
from jax.experimental.pallas import tpu as pltpu


# -----------------------------------------------------------------------------
# Kernel bodies
# -----------------------------------------------------------------------------
def _mlp_ln_core(x, w1, b1, gamma, beta, w2, b2):
    """Linear -> LayerNorm -> ReLU -> (Dropout=identity, eval) -> Linear.

    Matmul operands in bf16 (weights already bf16), f32 accumulation on the MXU;
    all elementwise / LayerNorm math stays in f32.
    """
    h = jnp.dot(x.astype(jnp.bfloat16), w1, preferred_element_type=jnp.float32) + b1
    mu = jnp.mean(h, axis=-1, keepdims=True)
    # Single-pass variance; clamp tiny negative values from cancellation.
    var = jnp.maximum(jnp.mean(h * h, axis=-1, keepdims=True) - mu * mu, 0.0)
    scale = gamma * jax.lax.rsqrt(var + 1e-5)               # folded gamma * inv_std
    h = jnp.maximum(h * scale + (beta - mu * scale), 0.0)   # LN + ReLU, one MA pass
    return jnp.dot(h.astype(jnp.bfloat16), w2, preferred_element_type=jnp.float32) + b2


def bio_to_quantum_kernel(bio_ref, w1_ref, b1_ref, g_ref, be_ref, w2_ref, b2_ref,
                          out_ref):
    """bio_state tile -> L2-normalized quantum params as one lane-dense slab.

    Columns [0:Q] real, [Q:2Q] imag, [2Q:out_pad] exact zeros (zero-padded weight
    columns). The complex L2 norm is the row-wise sum of squares over the whole
    slab (padded columns contribute 0), so no unaligned slice is needed in-kernel.
    """
    out = _mlp_ln_core(bio_ref[...], w1_ref[...], b1_ref[...],
                       g_ref[...], be_ref[...], w2_ref[...], b2_ref[...])
    sumsq = jnp.sum(out * out, axis=-1, keepdims=True)
    # F.normalize(p=2, eps=1e-12): x / max(||x||, 1e-12) == x * rsqrt(max(||x||^2, 1e-24))
    out_ref[...] = out * jax.lax.rsqrt(jnp.maximum(sumsq, 1e-24))


def quantum_to_bio_kernel(qr_ref, qi_ref, w1_ref, b1_ref, g_ref, be_ref, w2_ref, b2_ref,
                          bio_ref):
    """|quantum_state|^2 measurement -> bio_state MLP (per batch tile)."""
    qr = qr_ref[...]
    qi = qi_ref[...]
    measurement = qr * qr + qi * qi                          # torch.abs(q) ** 2
    bio_ref[...] = _mlp_ln_core(measurement, w1_ref[...], b1_ref[...],
                                g_ref[...], be_ref[...], w2_ref[...], b2_ref[...])


# -----------------------------------------------------------------------------
# Wrapper helpers
# -----------------------------------------------------------------------------
def _round_up(x, m):
    return ((x + m - 1) // m) * m


def _batch_tile(b):
    """Large tiles amortize per-step overhead; cap so the grid has >=2 steps when
    possible so the "parallel" batch axis can shard across v7x's two TensorCores."""
    if b <= 8:
        return b                                   # single block == full batch dim
    half = _round_up(pl.cdiv(b, 2), 8)             # multiple of 8 sublanes, <= b
    return min(1024, half)


def _resident_spec(arr):
    # Full-array block, constant block index -> stays VMEM-resident across the grid.
    zeros = (0,) * arr.ndim
    return pl.BlockSpec(arr.shape, lambda *_, z=zeros: z)


def _vmem_limit_bytes(tb, in_cols, out_cols, params):
    """~2x (double-buffered activation tiles + weights) + headroom; keeps v5e's
    16 MiB scoped default from shrinking the pipeline at larger tiles."""
    tile_bytes = tb * (in_cols + out_cols) * 4
    w_bytes = sum(int(p.size) * p.dtype.itemsize for p in params)
    need = 2 * 2 * tile_bytes + 2 * w_bytes + (4 << 20)
    return int(min(max(need, 16 << 20), 64 << 20))


# -----------------------------------------------------------------------------
# pallas_call wrappers
# -----------------------------------------------------------------------------
@functools.partial(jax.jit, static_argnames=("quantum_dim",))
def bio_to_quantum_state(bio, params, *, quantum_dim):
    b, bio_dim = bio.shape
    w1, b1, g, be, w2, b2 = params
    hidden = w1.shape[1]
    out_pad = w2.shape[1]                               # lane-dense (multiple of 128)

    tb = _batch_tile(b)
    grid = (pl.cdiv(b, tb),)

    cost = pl.CostEstimate(
        flops=2 * b * (bio_dim * hidden + hidden * out_pad),
        transcendentals=2 * b,                          # LN rsqrt + norm rsqrt per row
        bytes_accessed=4 * b * (bio_dim + out_pad)
        + 2 * (bio_dim * hidden + hidden * out_pad)
        + 4 * (3 * hidden + out_pad),
    )

    out = pl.pallas_call(
        bio_to_quantum_kernel,
        out_shape=jax.ShapeDtypeStruct((b, out_pad), jnp.float32),
        grid=grid,
        in_specs=[pl.BlockSpec((tb, bio_dim), lambda i: (i, 0)),
                  _resident_spec(w1), _resident_spec(b1),
                  _resident_spec(g), _resident_spec(be),
                  _resident_spec(w2), _resident_spec(b2)],
        out_specs=pl.BlockSpec((tb, out_pad), lambda i: (i, 0)),
        compiler_params=pltpu.CompilerParams(
            dimension_semantics=("parallel",),
            vmem_limit_bytes=_vmem_limit_bytes(tb, bio_dim, out_pad, params)),
        cost_estimate=cost,
    )(bio, w1, b1, g, be, w2, b2)

    # Lane-aligned slab; real/imag split (and padded-column drop) in plain JAX.
    return out[:, :quantum_dim], out[:, quantum_dim:2 * quantum_dim]


@functools.partial(jax.jit, static_argnames=("bio_dim",))
def quantum_to_bio_state(q_real, q_imag, params, *, bio_dim):
    b, qdim = q_real.shape
    w1, b1, g, be, w2, b2 = params
    hidden = w1.shape[1]
    out_pad = w2.shape[1]                               # lane-dense (multiple of 128)

    tb = _batch_tile(b)
    grid = (pl.cdiv(b, tb),)

    cost = pl.CostEstimate(
        flops=2 * b * (qdim * hidden + hidden * out_pad) + 3 * b * qdim,
        transcendentals=b,                              # LN rsqrt per row
        bytes_accessed=4 * b * (2 * qdim + out_pad)
        + 2 * (qdim * hidden + hidden * out_pad)
        + 4 * (3 * hidden + out_pad),
    )

    out = pl.pallas_call(
        quantum_to_bio_kernel,
        out_shape=jax.ShapeDtypeStruct((b, out_pad), jnp.float32),
        grid=grid,
        in_specs=[pl.BlockSpec((tb, qdim), lambda i: (i, 0)),
                  pl.BlockSpec((tb, qdim), lambda i: (i, 0)),
                  _resident_spec(w1), _resident_spec(b1),
                  _resident_spec(g), _resident_spec(be),
                  _resident_spec(w2), _resident_spec(b2)],
        out_specs=pl.BlockSpec((tb, out_pad), lambda i: (i, 0)),
        compiler_params=pltpu.CompilerParams(
            dimension_semantics=("parallel",),
            vmem_limit_bytes=_vmem_limit_bytes(tb, 2 * qdim, out_pad, params)),
        cost_estimate=cost,
    )(q_real, q_imag, w1, b1, g, be, w2, b2)

    return out[:, :bio_dim]


# -----------------------------------------------------------------------------
# Module port
# -----------------------------------------------------------------------------
class EnhancedBioEntropicBridgePallas:
    """JAX/Pallas port of EnhancedBioEntropicBridge (eval-mode semantics)."""

    def __init__(self, bio_dim, quantum_dim, hidden_dim=64, seed=0):
        self.bio_dim = bio_dim
        self.quantum_dim = quantum_dim
        self.hidden_dim = hidden_dim
        key = jax.random.PRNGKey(seed)
        ks = jax.random.split(key, 8)

        def linear(kw, kb, fan_in, fan_out):
            bound = 1.0 / float(jnp.sqrt(float(fan_in)))
            w = jax.random.uniform(kw, (fan_in, fan_out), jnp.float32, -bound, bound)
            b = jax.random.uniform(kb, (1, fan_out), jnp.float32, -bound, bound)
            return w, b

        def pack(w1, b1, w2, b2, hidden, out_w):
            # Zero-pad the OUTPUT columns to a multiple of 128 (lane-dense stores);
            # padded columns produce exactly 0 so downstream math is unchanged.
            out_pad = _round_up(out_w, 128)
            if out_pad != out_w:
                w2 = jnp.pad(w2, ((0, 0), (0, out_pad - out_w)))
                b2 = jnp.pad(b2, ((0, 0), (0, out_pad - out_w)))
            return (w1.astype(jnp.bfloat16), b1,
                    jnp.ones((1, hidden), jnp.float32),    # LayerNorm gamma
                    jnp.zeros((1, hidden), jnp.float32),   # LayerNorm beta
                    w2.astype(jnp.bfloat16), b2)

        # quantum_to_bio: Linear(Q,H) -> LN(H) -> ReLU -> Dropout -> Linear(H,bio)
        w1, b1 = linear(ks[0], ks[1], quantum_dim, hidden_dim)
        w2, b2 = linear(ks[2], ks[3], hidden_dim, bio_dim)
        self.q2b_params = pack(w1, b1, w2, b2, hidden_dim, bio_dim)

        # bio_to_quantum: Linear(bio,H) -> LN(H) -> ReLU -> Dropout -> Linear(H, 2*Q)
        w3, b3 = linear(ks[4], ks[5], bio_dim, hidden_dim)
        w4, b4 = linear(ks[6], ks[7], hidden_dim, 2 * quantum_dim)
        self.b2q_params = pack(w3, b3, w4, b4, hidden_dim, 2 * quantum_dim)

    def forward(self, bio_state=None, quantum_state=None):
        # Rank-1 density matrix (outer(v, v.conj())) => a single significant eigenvalue
        # => max_entropy = log2(1) = 0 => reference returns uncertainty exactly 0.0.
        uncertainty = 0.0
        if bio_state is not None:
            real, imag = bio_to_quantum_state(bio_state, self.b2q_params,
                                              quantum_dim=self.quantum_dim)
            return (real, imag), uncertainty
        elif quantum_state is not None:
            q_real, q_imag = quantum_state
            bio = quantum_to_bio_state(q_real, q_imag, self.q2b_params,
                                       bio_dim=self.bio_dim)
            return bio, uncertainty
        else:
            raise ValueError("Either bio_state or quantum_state must be provided")


# -----------------------------------------------------------------------------
# Plain-JAX reference (same bf16-operand matmul convention) for cross-checking
# -----------------------------------------------------------------------------
def _ref_mlp(x, params, out_w):
    w1, b1, g, be, w2, b2 = params
    h = jnp.dot(x.astype(jnp.bfloat16), w1, preferred_element_type=jnp.float32) + b1
    mu = h.mean(-1, keepdims=True)
    var = ((h - mu) ** 2).mean(-1, keepdims=True)
    h = (h - mu) * jax.lax.rsqrt(var + 1e-5) * g + be
    h = jnp.maximum(h, 0.0)
    out = jnp.dot(h.astype(jnp.bfloat16), w2, preferred_element_type=jnp.float32) + b2
    return out[:, :out_w]


# -----------------------------------------------------------------------------
# Demo / smoke test
# -----------------------------------------------------------------------------
if __name__ == "__main__":
    B, BIO_DIM, QUANTUM_DIM, HIDDEN = 2, 32, 16, 32

    bridge = EnhancedBioEntropicBridgePallas(BIO_DIM, QUANTUM_DIM, HIDDEN, seed=0)

    key = jax.random.PRNGKey(0)
    k_bio, k_qr, k_qi = jax.random.split(key, 3)
    bio_state = jax.random.normal(k_bio, (B, BIO_DIM), jnp.float32)

    # Path 1: bio -> quantum
    (q_real, q_imag), unc1 = bridge.forward(bio_state=bio_state)
    jax.block_until_ready((q_real, q_imag))

    # Sanity: unit L2 norm per row (complex L2 normalization).
    norms = jnp.sqrt(jnp.sum(q_real * q_real + q_imag * q_imag, axis=-1))
    assert bool(jnp.all(jnp.abs(norms - 1.0) < 1e-3))

    # Cross-check against plain-JAX reference.
    qp = _ref_mlp(bio_state, bridge.b2q_params, 2 * QUANTUM_DIM)
    r_ref, i_ref = qp[:, :QUANTUM_DIM], qp[:, QUANTUM_DIM:]
    n_ref = jnp.maximum(
        jnp.sqrt(jnp.sum(r_ref ** 2 + i_ref ** 2, -1, keepdims=True)), 1e-12)
    assert bool(jnp.all(jnp.abs(q_real - r_ref / n_ref) < 2e-3))
    assert bool(jnp.all(jnp.abs(q_imag - i_ref / n_ref) < 2e-3))

    # Path 2: quantum -> bio
    qr_in = jax.random.normal(k_qr, (B, QUANTUM_DIM), jnp.float32)
    qi_in = jax.random.normal(k_qi, (B, QUANTUM_DIM), jnp.float32)
    bio_out, unc2 = bridge.forward(quantum_state=(qr_in, qi_in))
    jax.block_until_ready(bio_out)

    bio_ref = _ref_mlp(qr_in * qr_in + qi_in * qi_in, bridge.q2b_params, BIO_DIM)
    assert bool(jnp.all(jnp.abs(bio_out - bio_ref) < 2e-3))

    assert q_real.shape == (B, QUANTUM_DIM) and q_imag.shape == (B, QUANTUM_DIM)
    assert bio_out.shape == (B, BIO_DIM)
    assert unc1 == 0.0 and unc2 == 0.0

    print("KERNEL_OK")
</pallas_src>

<mosaic_0001>
module attributes {stable_mosaic.version = 11 : i64} {
  func.func @bio_to_quantum_kernel(%arg0: i32, %arg1: memref<2x32xf32, #tpu.memory_space<vmem>>, %arg2: memref<32x32xbf16, #tpu.memory_space<vmem>>, %arg3: memref<1x32xf32, #tpu.memory_space<vmem>>, %arg4: memref<1x32xf32, #tpu.memory_space<vmem>>, %arg5: memref<1x32xf32, #tpu.memory_space<vmem>>, %arg6: memref<32x128xbf16, #tpu.memory_space<vmem>>, %arg7: memref<1x128xf32, #tpu.memory_space<vmem>>, %arg8: memref<2x128xf32, #tpu.memory_space<vmem>>) attributes {dimension_semantics = [#tpu.dimension_semantics<parallel>], iteration_bounds = array<i64: 1>, scalar_prefetch = 0 : i64, scratch_operands = 0 : i64, tpu.core_type = #tpu.core_type<tc>, window_params = [{transform_indices = @transform_0, window_bounds = array<i64: 2, 32>}, {pipeline_mode = #tpu.pipeline_mode<synchronous>, transform_indices = @transform_1, window_bounds = array<i64: 32, 32>}, {pipeline_mode = #tpu.pipeline_mode<synchronous>, transform_indices = @transform_2, window_bounds = array<i64: 1, 32>}, {pipeline_mode = #tpu.pipeline_mode<synchronous>, transform_indices = @transform_3, window_bounds = array<i64: 1, 32>}, {pipeline_mode = #tpu.pipeline_mode<synchronous>, transform_indices = @transform_4, window_bounds = array<i64: 1, 32>}, {pipeline_mode = #tpu.pipeline_mode<synchronous>, transform_indices = @transform_5, window_bounds = array<i64: 32, 128>}, {pipeline_mode = #tpu.pipeline_mode<synchronous>, transform_indices = @transform_6, window_bounds = array<i64: 1, 128>}, {transform_indices = @transform_7, window_bounds = array<i64: 2, 128>}]} {
    %c0 = arith.constant 0 : index
    %c0_0 = arith.constant 0 : index
    %0 = vector.load %arg1[%c0, %c0_0] : memref<2x32xf32, #tpu.memory_space<vmem>>, vector<2x32xf32>
    %c0_1 = arith.constant 0 : index
    %c0_2 = arith.constant 0 : index
    %1 = vector.load %arg2[%c0_1, %c0_2] : memref<32x32xbf16, #tpu.memory_space<vmem>>, vector<32x32xbf16>
    %c0_3 = arith.constant 0 : index
    %c0_4 = arith.constant 0 : index
    %2 = vector.load %arg3[%c0_3, %c0_4] : memref<1x32xf32, #tpu.memory_space<vmem>>, vector<1x32xf32>
    %c0_5 = arith.constant 0 : index
    %c0_6 = arith.constant 0 : index
    %3 = vector.load %arg4[%c0_5, %c0_6] : memref<1x32xf32, #tpu.memory_space<vmem>>, vector<1x32xf32>
    %c0_7 = arith.constant 0 : index
    %c0_8 = arith.constant 0 : index
    %4 = vector.load %arg5[%c0_7, %c0_8] : memref<1x32xf32, #tpu.memory_space<vmem>>, vector<1x32xf32>
    %c0_9 = arith.constant 0 : index
    %c0_10 = arith.constant 0 : index
    %5 = vector.load %arg6[%c0_9, %c0_10] : memref<32x128xbf16, #tpu.memory_space<vmem>>, vector<32x128xbf16>
    %c0_11 = arith.constant 0 : index
    %c0_12 = arith.constant 0 : index
    %6 = vector.load %arg7[%c0_11, %c0_12] : memref<1x128xf32, #tpu.memory_space<vmem>>, vector<1x128xf32>
    %7 = arith.truncf %0 : vector<2x32xf32> to vector<2x32xbf16>
    %cst = arith.constant dense<0.000000e+00> : vector<2x32xf32>
    %8 = tpu.matmul %7, %1, %cst {dimension_numbers = #tpu.dot_dimension_numbers<[1], [0], [0], [1], [0, 0, 1, 1], [], []>} : vector<2x32xbf16>, vector<32x32xbf16>, vector<2x32xf32> -> vector<2x32xf32>
    %9 = vector.broadcast %2 : vector<1x32xf32> to vector<2x32xf32>
    %10 = arith.addf %8, %9 : vector<2x32xf32>
    %cst_13 = arith.constant dense<0.000000e+00> : vector<2xf32>
    %11 = vector.multi_reduction <add>, %10, %cst_13 [1] : vector<2x32xf32> to vector<2xf32>
    %12 = vector.shape_cast %11 : vector<2xf32> to vector<2x1xf32>
    %cst_14 = arith.constant 3.200000e+01 : f32
    %13 = vector.broadcast %cst_14 : f32 to vector<2x1xf32>
    %14 = arith.divf %12, %13 : vector<2x1xf32>
    %15 = arith.mulf %10, %10 : vector<2x32xf32>
    %cst_15 = arith.constant dense<0.000000e+00> : vector<2xf32>
    %16 = vector.multi_reduction <add>, %15, %cst_15 [1] : vector<2x32xf32> to vector<2xf32>
    %17 = vector.shape_cast %16 : vector<2xf32> to vector<2x1xf32>
    %cst_16 = arith.constant 3.200000e+01 : f32
    %18 = vector.broadcast %cst_16 : f32 to vector<2x1xf32>
    %19 = arith.divf %17, %18 : vector<2x1xf32>
    %20 = arith.mulf %14, %14 : vector<2x1xf32>
    %21 = arith.subf %19, %20 : vector<2x1xf32>
    %cst_17 = arith.constant 0.000000e+00 : f32
    %22 = vector.broadcast %cst_17 : f32 to vector<2x1xf32>
    %23 = arith.maximumf %21, %22 : vector<2x1xf32>
    %cst_18 = arith.constant 9.99999974E-6 : f32
    %24 = vector.broadcast %cst_18 : f32 to vector<2x1xf32>
    %25 = arith.addf %23, %24 : vector<2x1xf32>
    %26 = math.rsqrt %25 : vector<2x1xf32>
    %27 = vector.broadcast %3 : vector<1x32xf32> to vector<2x32xf32>
    %28 = vector.broadcast %26 : vector<2x1xf32> to vector<2x32xf32>
    %29 = arith.mulf %27, %28 : vector<2x32xf32>
    %30 = arith.mulf %10, %29 : vector<2x32xf32>
    %31 = vector.broadcast %14 : vector<2x1xf32> to vector<2x32xf32>
    %32 = arith.mulf %31, %29 : vector<2x32xf32>
    %33 = vector.broadcast %4 : vector<1x32xf32> to vector<2x32xf32>
    %34 = arith.subf %33, %32 : vector<2x32xf32>
    %35 = arith.addf %30, %34 : vector<2x32xf32>
    %cst_19 = arith.constant 0.000000e+00 : f32
    %36 = vector.broadcast %cst_19 : f32 to vector<2x32xf32>
    %37 = arith.maximumf %35, %36 : vector<2x32xf32>
    %38 = arith.truncf %37 : vector<2x32xf32> to vector<2x32xbf16>
    %cst_20 = arith.constant dense<0.000000e+00> : vector<2x128xf32>
    %39 = tpu.matmul %38, %5, %cst_20 {dimension_numbers = #tpu.dot_dimension_numbers<[1], [0], [0], [1], [0, 0, 1, 1], [], []>} : vector<2x32xbf16>, vector<32x128xbf16>, vector<2x128xf32> -> vector<2x128xf32>
    %40 = vector.broadcast %6 : vector<1x128xf32> to vector<2x128xf32>
    %41 = arith.addf %39, %40 : vector<2x128xf32>
    %42 = arith.mulf %41, %41 : vector<2x128xf32>
    %cst_21 = arith.constant dense<0.000000e+00> : vector<2xf32>
    %43 = vector.multi_reduction <add>, %42, %cst_21 [1] : vector<2x128xf32> to vector<2xf32>
    %44 = vector.shape_cast %43 : vector<2xf32> to vector<2x1xf32>
    %cst_22 = arith.constant 1.000000e-24 : f32
    %45 = vector.broadcast %cst_22 : f32 to vector<2x1xf32>
    %46 = arith.maximumf %44, %45 : vector<2x1xf32>
    %47 = math.rsqrt %46 : vector<2x1xf32>
    %48 = vector.broadcast %47 : vector<2x1xf32> to vector<2x128xf32>
    %49 = arith.mulf %41, %48 : vector<2x128xf32>
    %c0_23 = arith.constant 0 : index
    %c0_24 = arith.constant 0 : index
    %50 = vector.load %arg8[%c0_23, %c0_24] : memref<2x128xf32, #tpu.memory_space<vmem>>, vector<2x128xf32>
    tpu.vector_store %arg8[%c0_23, %c0_24], %49 {strides = array<i32>} : memref<2x128xf32, #tpu.memory_space<vmem>>, vector<2x128xf32>,
    return
  }
  func.func @transform_0(%arg0: i32) -> (i32, i32) {
    %c0_i32 = arith.constant 0 : i32
    %c0_i32_0 = arith.constant 0 : i32
    return %arg0, %c0_i32 : i32, i32
  }
  func.func @transform_1(%arg0: i32) -> (i32, i32) {
    %c0_i32 = arith.constant 0 : i32
    %c0_i32_0 = arith.constant 0 : i32
    %c0_i32_1 = arith.constant 0 : i32
    return %c0_i32, %c0_i32_0 : i32, i32
  }
  func.func @transform_2(%arg0: i32) -> (i32, i32) {
    %c0_i32 = arith.constant 0 : i32
    %c0_i32_0 = arith.constant 0 : i32
    %c0_i32_1 = arith.constant 0 : i32
    return %c0_i32, %c0_i32_0 : i32, i32
  }
  func.func @transform_3(%arg0: i32) -> (i32, i32) {
    %c0_i32 = arith.constant 0 : i32
    %c0_i32_0 = arith.constant 0 : i32
    %c0_i32_1 = arith.constant 0 : i32
    return %c0_i32, %c0_i32_0 : i32, i32
  }
  func.func @transform_4(%arg0: i32) -> (i32, i32) {
    %c0_i32 = arith.constant 0 : i32
    %c0_i32_0 = arith.constant 0 : i32
    %c0_i32_1 = arith.constant 0 : i32
    return %c0_i32, %c0_i32_0 : i32, i32
  }
  func.func @transform_5(%arg0: i32) -> (i32, i32) {
    %c0_i32 = arith.constant 0 : i32
    %c0_i32_0 = arith.constant 0 : i32
    %c0_i32_1 = arith.constant 0 : i32
    return %c0_i32, %c0_i32_0 : i32, i32
  }
  func.func @transform_6(%arg0: i32) -> (i32, i32) {
    %c0_i32 = arith.constant 0 : i32
    %c0_i32_0 = arith.constant 0 : i32
    %c0_i32_1 = arith.constant 0 : i32
    return %c0_i32, %c0_i32_0 : i32, i32
  }
  func.func @transform_7(%arg0: i32) -> (i32, i32) {
    %c0_i32 = arith.constant 0 : i32
    %c0_i32_0 = arith.constant 0 : i32
    return %arg0, %c0_i32 : i32, i32
  }
}

</mosaic_0001>

<bundles_post_ra>
// kernel: bio_to_quantum_state.1
= control target key start
LH: loop header
LB: loop body
LE: loop exit
PB: predicated region body
PF: predicated region fallthrough
CT: control target
= control target key end

     0   :  { %12 = vsyncpa [#allocation3], 0  ;;  %s471_s0 = inlined_call_operand.hbm [shape: f32[2,32], index: 0, kind: input, shape index: {}]   ;;  %s472_s1 = inlined_call_operand.hbm [shape: bf16[32,32], index: 1, kind: input, shape index: {}]   ;;  %s473_s2 = inlined_call_operand.vmem [shape: f32[1,32], index: 2, kind: input, shape index: {}]   ;;  %s474_s3 = inlined_call_operand.vmem [shape: f32[1,32], index: 3, kind: input, shape index: {}]   ;;  %s475_s4 = inlined_call_operand.hbm [shape: f32[1,32], index: 4, kind: input, shape index: {}]   ;;  %s476_s5 = inlined_call_operand.vmem [shape: bf16[32,128], index: 5, kind: input, shape index: {}]   ;;  %s477_s6 = inlined_call_operand.vmem [shape: f32[1,128], index: 6, kind: input, shape index: {}]   ;;  %s478_s7 = inlined_call_operand.vmem [shape: f32[2,128], index: 7, kind: output, shape index: {}]  }
   0x1   :  { %13 = vsyncpa [#allocation5], 0  ;;  %s368_s24 = smov [#allocation4]   ;;  %s298_s28 = scalar_lea.hbm %s472_s1, 256 }
   0x2   :  { %s29_s25 = sshll.u32 %s368_s24, 4  ;;  %p299_p0 = scmp.ne.s32.totalorder %s472_s1, %s298_s28  ;;  %s30_s25 = int_to_ptr.vmem [resolvable:$true] %s29_s25 }
   0x3   :  { %p302_p1 = scmp.lt.u32.totalorder %s298_s28, %s472_s1 }
   0x5   :  { %p304_p2 = pnand %p302_p1, %p299_p0 }
   0x7   :  { %307 = shalt.err (!%p304_p2)
}
   0x8   :  { %s308_s10 = scalar_lea.vmem %s30_s25, 256  ;;  %p313_p4 = scmp.lt.s32.totalorder %s30_s25, %s30_s25 }
   0x9   :  { %p309_p3 = scmp.ne.s32.totalorder %s30_s25, %s308_s10  ;;  %p314_p5 = scmp.lt.s32.totalorder %s308_s10, %s308_s10 }
   0xb   :  { %p315_p6 = por %p314_p5, %p313_p4 }
   0xd   :  { %p316_p7 = pnand %p315_p6, %p309_p3 }
   0xf   :  { %319 = shalt.err (!%p316_p7)
}
  0x10   :  { %s369_s11 = smov 64   ;;  %s370_s12 = smov 4  }
  0x11   :  { %35 = dma.hbm_to_vmem [thread:$0]  %s472_s1, 256, %s30_s25, [#allocation5], %s369_s11, %s369_s11, %s370_s12  }
  0x12   :  { %s371_s15 = smov [#allocation2]   ;;  %s372_s17 = smov [#allocation6]  }
  0x13   :  { %s20_s16 = sshll.u32 %s371_s15, 4  ;;  %s46_s18 = sshll.u32 %s372_s17, 4  ;;  %s21_s16 = int_to_ptr.vmem [resolvable:$true] %s20_s16  ;;  %s47_s18 = int_to_ptr.vmem [resolvable:$true] %s46_s18 }
  0x14   :  { %s320_s21 = scalar_lea.hbm %s471_s0, 32 }
  0x15   :  { %p321_p8 = scmp.ne.s32.totalorder %s471_s0, %s320_s21  ;;  %p324_p9 = scmp.lt.u32.totalorder %s320_s21, %s471_s0 }
  0x17   :  { %p326_p10 = pnand %p324_p9, %p321_p8 }
  0x19   :  { %329 = shalt.err (!%p326_p10)
}
  0x1a   :  { %s330_s1 = scalar_lea.vmem %s21_s16, 32  ;;  %p335_p12 = scmp.lt.s32.totalorder %s21_s16, %s21_s16 }
  0x1b   :  { %p331_p11 = scmp.ne.s32.totalorder %s21_s16, %s330_s1  ;;  %p336_p13 = scmp.lt.s32.totalorder %s330_s1, %s330_s1 }
  0x1d   :  { %p337_p0 = por %p336_p13, %p335_p12 }
  0x1f   :  { %p338_p1 = pnand %p337_p0, %p331_p11 }
  0x21   :  { %341 = shalt.err (!%p338_p1)
}
  0x22   :  { %23 = dma.hbm_to_vmem [thread:$0]  %s471_s0, 32, %s21_s16, [#allocation3]  }
  0x23   :  { %s342_s30 = scalar_lea.hbm %s475_s4, 16 }
  0x24   :  { %p343_p2 = scmp.ne.s32.totalorder %s475_s4, %s342_s30  ;;  %p346_p3 = scmp.lt.u32.totalorder %s342_s30, %s475_s4 }
  0x26   :  { %p348_p4 = pnand %p346_p3, %p343_p2 }
  0x28   :  { %351 = shalt.err (!%p348_p4)
}
  0x29   :  { %s352_s12 = scalar_lea.vmem %s47_s18, 16  ;;  %s356_s13 = scalar_lea.vmem %s47_s18, 32 }
  0x2a   :  { %p353_p5 = scmp.ne.s32.totalorder %s47_s18, %s352_s12  ;;  %p357_p6 = scmp.lt.s32.totalorder %s47_s18, %s47_s18 }
  0x2b   :  { %p358_p7 = scmp.lt.s32.totalorder %s356_s13, %s352_s12 }
  0x2d   :  { %p359_p8 = por %p358_p7, %p357_p6 }
  0x2f   :  { %p360_p9 = pnand %p359_p8, %p353_p5 }
  0x31   :  { %363 = shalt.err (!%p360_p9)
}
  0x32   :  { %49 = dma.hbm_to_vmem [thread:$0]  %s475_s4, 16, %s47_s18, [#allocation5]  }
  0x33   :  { %364 = dma.done.wait [#allocation3], 32  }
  0x34   :  { %365 = vsyncadd [#allocation3], 4294967264 }
  0x35   :  { %366 = dma.done.wait [#allocation5], 272  }
  0x36   :  { %367 = vsyncadd [#allocation5], 4294967024  ;;  %v373_v0 = vmov 0.0   ;;  %vm374_vm0 = vmmov 0   ;;  %v290_v1 = vld [vmem:[#allocation4] sm:$0xff]   ;;  %v291_v2 = vld [vmem:[#allocation4 + $0x8] sm:$0xff]  }
  0x37   :  { %267 = vmatprep.subr.bf16.mxu0 %v373_v0  ;;  %271 = vmatprep.mubr.msk.bf16.mxu0 %vm374_vm0, %v373_v0  ;;  %v64_v3 = vld [vmem:[#allocation2] sm:$0x3]  ;;  %vm96_vm1 = vcmask 261120   ;;  %v251_v5 = vld [vmem:[%s473_s2] ss:$0 sm:$0xff]  ;;  %vm140_vm2 = vcmask 254976  }
  0x38   :  { %275 = vmatprep.subr.bf16.mxu1 %v373_v0  ;;  %279 = vmatprep.mubr.msk.bf16.mxu1 %vm374_vm0, %v373_v0  ;;  %v77_v4 = vpack.c.bf16 %v64_v3, %v64_v3  ;;  %v292_v14 = vld [vmem:[%s476_s5] sm:$0xff]   ;;  %v293_v15 = vld [vmem:[%s476_s5 + $0x8] sm:$0xff]   ;;  %vm237_vm3 = vcmask 1041408  }
  0x39   :  { %268 = vmatpush3.bf16.msra.mxu0 %v290_v1  ;;  %276 = vmatpush3.bf16.msra.mxu1 %v292_v14  ;;  %v255_v24 = vld [vmem:[%s474_s3] ss:$0 sm:$0xff]  ;;  %v256_v27 = vld [vmem:[#allocation6] ss:$0 sm:$0xff] }
  0x3a   :  { %269 = vmatprep.subr.bf16.mxu0 %v373_v0  ;;  %277 = vmatprep.subr.bf16.mxu1 %v373_v0  ;;  %v257_v34 = vld [vmem:[%s477_s6] ss:$0 sm:$0xff] }
  0x3d   :  { %270 = vmatpush3.bf16.msra.mxu0 %v291_v2  ;;  %278 = vmatpush3.bf16.msra.mxu1 %v293_v15 }
  0x40   :  { %272 = vmatmul.mubr.msk.bf16.vlgmr.msra.gmra.mrb[0].mxu0 %vm96_vm1, %v77_v4 }
 0x113   :  { %v134_v6 = vpop.f32.mrb[0].mxu0 }
 0x114   :  { %v135_v7 = vadd.f32 %v251_v5, %v134_v6  ;;  %v273_v8 = vpop.f32.mrb[1].mxu0 }
 0x115   :  { %v137_v9 = vpop.f32.mrb[2].mxu0 }
 0x116   :  { %v274_v10 = vpop.f32.mrb[3].mxu0  ;;  %v141_v11 = vsel %vm140_vm2, %v135_v7, 0.0  ;;  %v146_v12 = vmul.f32 %v135_v7, %v135_v7 }
 0x117   :  { %142 = vadd.xlane.f32.xlu0 %v141_v11 }
 0x118   :  { %v147_v13 = vsel %vm140_vm2, %v146_v12, 0.0 }
 0x11b   :  { %148 = vadd.xlane.f32.xlu0 %v147_v13 }
 0x1a4   :  { %v143_v16 = vpop.xlane.xlu0 %142 }
 0x1a5   :  { %v145_v17 = vmul.f32 0.03125, %v143_v16 }
 0x1a7   :  { %v151_v19 = vmul.f32 %v145_v17, %v145_v17 }
 0x1a8   :  { %v149_v18 = vpop.xlane.xlu0 %148 }
 0x1a9   :  { %v150_v20 = vmul.f32 0.03125, %v149_v18 }
 0x1ab   :  { %v152_v21 = vsub.f32 %v150_v20, %v151_v19 }
 0x1ad   :  { %v153_v22 = vmax.f32 %v152_v21, 0.0 }
 0x1af   :  { %v154_v23 = vadd.f32 1e-05, %v153_v22 }
 0x1b1   :  { %294 = vrsqrt.f32 %v154_v23 }
 0x1bb   :  { %v295_v25 = vpop.eup %294 }
 0x1bc   :  { %v162_v26 = vmul.f32 %v295_v25, %v255_v24 }
 0x1be   :  { %v164_v28 = vmul.f32 %v162_v26, %v145_v17  ;;  %v163_v29 = vmul.f32 %v162_v26, %v135_v7 }
 0x1c0   :  { %v171_v30 = vsub.f32 %v256_v27, %v164_v28 }
 0x1c2   :  { %v172_v31 = vadd.f32 %v171_v30, %v163_v29 }
 0x1c4   :  { %v173_v32 = vmax.f32 %v172_v31, 0.0 }
 0x1c6   :  { %v174_v33 = vpack.c.bf16 %v173_v32, %v173_v32 }
 0x1c8   :  { %280 = vmatmul.mubr.msk.bf16.vlgmr.msra.gmra.mrb[0].mxu1 %vm96_vm1, %v174_v33 }
 0x29b   :  { %v230_v35 = vpop.f32.mrb[0].mxu1 }
 0x29c   :  { %v231_v36 = vadd.f32 %v257_v34, %v230_v35  ;;  %v281_v37 = vpop.f32.mrb[1].mxu1 }
 0x29d   :  { %v233_v38 = vpop.f32.mrb[2].mxu1 }
 0x29e   :  { %v282_v39 = vpop.f32.mrb[3].mxu1  ;;  %v236_v40 = vmul.f32 %v231_v36, %v231_v36 }
 0x2a0   :  { %v238_v41 = vsel %vm237_vm3, %v236_v40, 0.0 }
 0x2a1   :  { %239 = vadd.xlane.f32.xlu1 %v238_v41 }
 0x32e   :  { %v240_v42 = vpop.xlane.xlu1 %239 }
 0x32f   :  { %v241_v43 = vmax.f32 %v240_v42, 1e-24 }
 0x331   :  { %296 = vrsqrt.f32 %v241_v43 }
 0x33b   :  { %v297_v44 = vpop.eup %296 }
 0x33c   :  { %v243_v45 = vmul.f32 %v297_v44, %v231_v36 }
 0x33e   :  { %244 = vst [vmem:[%s478_s7] sm:$0x3] %v243_v45 }
 0x33f   :  { %249 = vsyncpa [#allocation3], 1 }
 0x340   :  { %250 = vsyncpa [#allocation5], 1 }

</bundles_post_ra>
